<compile_context>
chip_gen: v5e
topology: v5e:2x2
jax: 0.10.0
libtpu: 0.0.40
codegen_flags: <defaults>
</compile_context>

<pallas_src>
import functools
import math

import jax
import jax.numpy as jnp
from jax import lax
from jax.experimental import pallas as pl
from jax.experimental.pallas import tpu as pltpu

# v7x has 2 TensorCores per chip; prefer >= 2 grid steps per core so DMAs of
# the x/output blocks overlap compute on every core.
_NUM_CORES_HINT = 2


def _gsa_kernel(n_tokens, b_blk, fuse_qkv, store_native,
                x_ref, wqkv_ref, bqkv_ref, w1_ref, b1_ref, o_ref):
    n = n_tokens
    d = x_ref.shape[2]

    # Cast to bf16 BEFORE the (n, d) -> (d, n) transpose: bf16 packs 2 elems per
    # 32-bit lane slot, halving XLU/vreg traffic for the in-VMEM permute.
    x_bf = x_ref[...].astype(jnp.bfloat16)                          # (B_blk, n, d)
    xt = jnp.transpose(x_bf, (0, 2, 1)).reshape(b_blk * d, n)       # (B_blk*d, n)

    # qkv projection; the softmax scale is pre-folded into the q weight/bias.
    if fuse_qkv:
        # n % 128 == 0: ONE fused dot (fills the MXU N dim 3x better), then
        # 128-aligned column slices of the f32 result.
        qkv = jnp.dot(xt, wqkv_ref[...],
                      preferred_element_type=jnp.float32) + bqkv_ref[...]
        q = qkv[:, 0 * n:1 * n]
        k = qkv[:, 1 * n:2 * n]
        v = qkv[:, 2 * n:3 * n]
    else:
        # Weight pre-shaped (3, n, n): leading-axis indexing, no lane slices at
        # non-128 column offsets (no per-step relayout copies).
        q = jnp.dot(xt, wqkv_ref[0], preferred_element_type=jnp.float32) + bqkv_ref[0:1, :]
        k = jnp.dot(xt, wqkv_ref[1], preferred_element_type=jnp.float32) + bqkv_ref[1:2, :]
        v = jnp.dot(xt, wqkv_ref[2], preferred_element_type=jnp.float32) + bqkv_ref[2:3, :]

    q3 = q.astype(jnp.bfloat16).reshape(b_blk, d, n)
    k3 = k.astype(jnp.bfloat16).reshape(b_blk, d, n)
    v3 = v.astype(jnp.bfloat16).reshape(b_blk, d, n)

    # Scores: per-batch (d, d), contraction over n with transposed RHS (no k.T copy).
    dots = lax.dot_general(q3, k3, (((2,), (2,)), ((0,), (0,))),
                           preferred_element_type=jnp.float32)      # (B, d, d) f32

    # Numerically-stable softmax in f32; reciprocal uses the otherwise-idle EUP slot.
    m = jnp.max(dots, axis=-1, keepdims=True)
    p = jnp.exp(dots - m)
    denom = jnp.sum(p, axis=-1, keepdims=True)
    attn = (p * pl.reciprocal(denom, approx=True)).astype(jnp.bfloat16)

    out = lax.dot_general(attn, v3, (((2,), (1,)), ((0,), (0,))),
                          preferred_element_type=jnp.float32)       # (B, d, n) f32

    # Output projection nn1 on the collapsed (B_blk*d, n) slab.
    out2 = out.astype(jnp.bfloat16).reshape(b_blk * d, n)
    y = jnp.dot(out2, w1_ref[...], preferred_element_type=jnp.float32) + b1_ref[...]
    y3 = y.reshape(b_blk, d, n).astype(o_ref.dtype)

    # TODO(synk): dropout (self.do1) omitted — identity in eval mode.

    if store_native:
        # Transpose back to the module's (b, n, d) layout in VMEM (cheap XLU op)
        # -> lane-dense HBM store and no wrapper permute (saves two HBM passes).
        o_ref[...] = jnp.transpose(y3, (0, 2, 1))                   # (B_blk, n, d)
    else:
        o_ref[...] = y3                                             # (B_blk, d, n)


def _vmem_limit_bytes():
    """~75% of physical per-core VMEM (headroom for Mosaic scratch/pipelining)."""
    cap = None
    try:
        cap = getattr(pltpu.get_tpu_info(), "vmem_capacity_bytes", None)
    except Exception:
        cap = None
    if not cap:
        cap = 64 * 1024 * 1024          # smallest per-core VMEM (v7x)
    return (int(cap) * 3) // 4


def _weights_vmem_bytes(n):
    """Resident bf16 weights + f32 biases (counted double-buffered to be safe)."""
    w = (3 * n * n + n * n) * 2 * 2
    bias = (3 * n + n) * 4 * 2
    return w + bias


def _per_step_vmem_bytes(b_blk, n, d):
    """Conservative per-grid-step footprint (bytes), excluding resident weights."""
    rows = b_blk * d
    io = 2 * 2 * (b_blk * n * d * 4)               # x block + out block, double-buffered f32
    proj = rows * n * (2 + 3 * 4 + 3 * 2)          # xt bf16; q/k/v f32 + bf16 copies
    scores = b_blk * d * d * (4 + 4 + 2)           # dots f32, p f32, attn bf16
    tail = rows * n * (4 + 2 + 4 + 4)              # out f32/bf16, y f32, y transposed
    return io + proj + scores + tail


def _pick_batch_block(b, n, d, budget_bytes):
    """Largest divisor of b whose per-step footprint fits the VMEM budget, preferring
    enough grid steps to keep every TensorCore's pipeline busy."""
    divisors = [c for c in range(1, b + 1) if b % c == 0]
    fitting = [c for c in divisors if _per_step_vmem_bytes(c, n, d) <= budget_bytes] or [1]
    min_steps = 2 * _NUM_CORES_HINT
    preferred = ([c for c in fitting if b // c >= min_steps]
                 or [c for c in fitting if b // c >= 2]
                 or fitting)
    return max(preferred)


def gs_attention(x, w_qkv, b_qkv, w_nn1, b_nn1):
    """GSAttention forward. x: (b, n, d) f32; weights in PyTorch (out, in) layout:
    w_qkv (3n, n), b_qkv (3n,), w_nn1 (n, n), b_nn1 (n,)."""
    b, n, d = x.shape
    scale = float(n) ** (-0.5)

    vmem_limit = _vmem_limit_bytes()
    budget = max(vmem_limit - _weights_vmem_bytes(n), 1 << 20)
    b_blk = _pick_batch_block(b, n, d, budget)
    grid = b // b_blk

    fuse_qkv = (n % 128 == 0)
    # Pick whichever output layout makes the last (lane) dim 128-friendly; the
    # native (b, n, d) layout also removes the wrapper permute entirely.
    store_native = (d % 128 == 0) or (n % 128 != 0)

    w_qkv_f = w_qkv.astype(jnp.float32)
    b_qkv_f = b_qkv.astype(jnp.float32)
    if fuse_qkv:
        # (n, 3n) (in, out) with the softmax scale folded into the q columns.
        col_scale = jnp.concatenate([jnp.full((n,), scale, jnp.float32),
                                     jnp.ones((2 * n,), jnp.float32)])
        wqkv_prep = (jnp.transpose(w_qkv_f) * col_scale[None, :]).astype(jnp.bfloat16)
        bqkv_prep = (b_qkv_f * col_scale).reshape(1, 3 * n)
        wqkv_spec = pl.BlockSpec((n, 3 * n), lambda i: (0, 0))
        bqkv_spec = pl.BlockSpec((1, 3 * n), lambda i: (0, 0))
    else:
        # (3, n, n) (chunk, in, out); chunk 0 (q) pre-scaled.
        w3 = jnp.transpose(w_qkv_f.reshape(3, n, n), (0, 2, 1))
        chunk_scale = jnp.array([scale, 1.0, 1.0], jnp.float32)
        wqkv_prep = (w3 * chunk_scale.reshape(3, 1, 1)).astype(jnp.bfloat16)
        bqkv_prep = b_qkv_f.reshape(3, n) * chunk_scale.reshape(3, 1)
        wqkv_spec = pl.BlockSpec((3, n, n), lambda i: (0, 0, 0))
        bqkv_spec = pl.BlockSpec((3, n), lambda i: (0, 0))

    w1_t = jnp.transpose(w_nn1.astype(jnp.float32)).astype(jnp.bfloat16)   # (n, n)
    b1_2 = b_nn1.astype(jnp.float32).reshape(1, n)

    kernel = functools.partial(_gsa_kernel, n, b_blk, fuse_qkv, store_native)

    out_shape = (b, n, d) if store_native else (b, d, n)
    out_block = (b_blk, n, d) if store_native else (b_blk, d, n)

    out = pl.pallas_call(
        kernel,
        out_shape=jax.ShapeDtypeStruct(out_shape, x.dtype),
        grid_spec=pltpu.PrefetchScalarGridSpec(
            num_scalar_prefetch=0,
            grid=(grid,),
            in_specs=[
                pl.BlockSpec((b_blk, n, d), lambda i: (i, 0, 0)),   # x in native layout
                wqkv_spec,                                          # qkv weights (bf16)
                bqkv_spec,                                          # qkv biases (f32)
                pl.BlockSpec((n, n), lambda i: (0, 0)),             # W_nn1^T (bf16)
                pl.BlockSpec((1, n), lambda i: (0, 0)),             # nn1 bias (f32)
            ],
            out_specs=pl.BlockSpec(out_block, lambda i: (i, 0, 0)),
        ),
        compiler_params=pltpu.CompilerParams(
            dimension_semantics=("parallel",),
            vmem_limit_bytes=vmem_limit,
        ),
    )(x, wqkv_prep, bqkv_prep, w1_t, b1_2)

    # Only needed when the (…, n)-last layout was chosen (n % 128 == 0, d not).
    return out if store_native else jnp.transpose(out, (0, 2, 1))


def _reference(x, w_qkv, b_qkv, w_nn1, b_nn1):
    b, n, d = x.shape
    scale = float(n) ** (-0.5)
    xp = jnp.transpose(x, (0, 2, 1))                        # (b, d, n)
    qkv = jnp.einsum("bdn,on->bdo", xp, w_qkv) + b_qkv      # (b, d, 3n)
    q, k, v = jnp.split(qkv, 3, axis=-1)
    dots = jnp.einsum("bdn,ben->bde", q, k) * scale
    attn = jax.nn.softmax(dots, axis=-1)
    out = jnp.einsum("bde,ben->bdn", attn, v)
    out = jnp.einsum("bdn,on->bdo", out, w_nn1) + b_nn1
    return jnp.transpose(out, (0, 2, 1))


if __name__ == "__main__":
    key = jax.random.PRNGKey(0)
    batch, num_tokens, seq = 2, 8, 32       # x: (b, n=num_tokens, d=seq)

    k_x, k_wqkv, k_bqkv, k_w1, k_b1 = jax.random.split(key, 5)
    x = jax.random.normal(k_x, (batch, num_tokens, seq), dtype=jnp.float32)

    # Deterministic parameter init (PyTorch Linear-style uniform bounds).
    bound = 1.0 / math.sqrt(num_tokens)
    w_qkv = jax.random.uniform(k_wqkv, (3 * num_tokens, num_tokens),
                               minval=-bound, maxval=bound, dtype=jnp.float32)
    b_qkv = jax.random.uniform(k_bqkv, (3 * num_tokens,),
                               minval=-bound, maxval=bound, dtype=jnp.float32)
    w_nn1 = jax.random.uniform(k_w1, (num_tokens, num_tokens),
                               minval=-bound, maxval=bound, dtype=jnp.float32)
    b_nn1 = jax.random.uniform(k_b1, (num_tokens,),
                               minval=-bound, maxval=bound, dtype=jnp.float32)

    fn = jax.jit(gs_attention)
    out = jax.block_until_ready(fn(x, w_qkv, b_qkv, w_nn1, b_nn1))

    ref = _reference(x, w_qkv, b_qkv, w_nn1, b_nn1)
    assert out.shape == (batch, num_tokens, seq), out.shape
    max_err = float(jnp.max(jnp.abs(out - ref)))
    # bf16 operands + approx reciprocal => compare against the f32 reference loosely.
    assert jnp.allclose(out, ref, atol=3e-2, rtol=3e-2), max_err

    print("KERNEL_OK")
</pallas_src>

<mosaic_0001>
module attributes {stable_mosaic.version = 11 : i64} {
  func.func @_gsa_kernel(%arg0: i32, %arg1: memref<1x8x32xf32, #tpu.memory_space<vmem>>, %arg2: memref<3x8x8xbf16, #tpu.memory_space<vmem>>, %arg3: memref<3x8xf32, #tpu.memory_space<vmem>>, %arg4: memref<8x8xbf16, #tpu.memory_space<vmem>>, %arg5: memref<1x8xf32, #tpu.memory_space<vmem>>, %arg6: memref<1x8x32xf32, #tpu.memory_space<vmem>>) attributes {dimension_semantics = [#tpu.dimension_semantics<parallel>], iteration_bounds = array<i64: 2>, scalar_prefetch = 0 : i64, scratch_operands = 0 : i64, tpu.core_type = #tpu.core_type<tc>, window_params = [{transform_indices = @transform_0, window_bounds = array<i64: 1, 8, 32>}, {pipeline_mode = #tpu.pipeline_mode<synchronous>, transform_indices = @transform_1, window_bounds = array<i64: 3, 8, 8>}, {pipeline_mode = #tpu.pipeline_mode<synchronous>, transform_indices = @transform_2, window_bounds = array<i64: 3, 8>}, {pipeline_mode = #tpu.pipeline_mode<synchronous>, transform_indices = @transform_3, window_bounds = array<i64: 8, 8>}, {pipeline_mode = #tpu.pipeline_mode<synchronous>, transform_indices = @transform_4, window_bounds = array<i64: 1, 8>}, {transform_indices = @transform_5, window_bounds = array<i64: 1, 8, 32>}]} {
    %c0 = arith.constant 0 : index
    %c0_0 = arith.constant 0 : index
    %c0_1 = arith.constant 0 : index
    %0 = vector.load %arg1[%c0, %c0_0, %c0_1] : memref<1x8x32xf32, #tpu.memory_space<vmem>>, vector<1x8x32xf32>
    %1 = arith.truncf %0 : vector<1x8x32xf32> to vector<1x8x32xbf16>
    %2 = tpu.transpose %1, [0, 2, 1] : vector<1x8x32xbf16> -> vector<1x32x8xbf16>
    %3 = vector.shape_cast %2 : vector<1x32x8xbf16> to vector<32x8xbf16>
    %c0_2 = arith.constant 0 : index
    %c0_3 = arith.constant 0 : index
    %c0_4 = arith.constant 0 : index
    %4 = vector.load %arg2[%c0_2, %c0_3, %c0_4] : memref<3x8x8xbf16, #tpu.memory_space<vmem>>, vector<1x8x8xbf16>
    %5 = vector.shape_cast %4 : vector<1x8x8xbf16> to vector<8x8xbf16>
    %cst = arith.constant dense<0.000000e+00> : vector<32x8xf32>
    %6 = tpu.matmul %3, %5, %cst {dimension_numbers = #tpu.dot_dimension_numbers<[1], [0], [0], [1], [0, 0, 1, 1], [], []>} : vector<32x8xbf16>, vector<8x8xbf16>, vector<32x8xf32> -> vector<32x8xf32>
    %c0_5 = arith.constant 0 : index
    %c0_6 = arith.constant 0 : index
    %7 = vector.load %arg3[%c0_5, %c0_6] : memref<3x8xf32, #tpu.memory_space<vmem>>, vector<1x8xf32>
    %8 = vector.broadcast %7 : vector<1x8xf32> to vector<32x8xf32>
    %9 = arith.addf %6, %8 : vector<32x8xf32>
    %c1 = arith.constant 1 : index
    %c0_7 = arith.constant 0 : index
    %c0_8 = arith.constant 0 : index
    %10 = vector.load %arg2[%c1, %c0_7, %c0_8] : memref<3x8x8xbf16, #tpu.memory_space<vmem>>, vector<1x8x8xbf16>
    %11 = vector.shape_cast %10 : vector<1x8x8xbf16> to vector<8x8xbf16>
    %cst_9 = arith.constant dense<0.000000e+00> : vector<32x8xf32>
    %12 = tpu.matmul %3, %11, %cst_9 {dimension_numbers = #tpu.dot_dimension_numbers<[1], [0], [0], [1], [0, 0, 1, 1], [], []>} : vector<32x8xbf16>, vector<8x8xbf16>, vector<32x8xf32> -> vector<32x8xf32>
    %c1_10 = arith.constant 1 : index
    %c0_11 = arith.constant 0 : index
    %13 = vector.load %arg3[%c1_10, %c0_11] : memref<3x8xf32, #tpu.memory_space<vmem>>, vector<1x8xf32>
    %14 = vector.broadcast %13 : vector<1x8xf32> to vector<32x8xf32>
    %15 = arith.addf %12, %14 : vector<32x8xf32>
    %c2 = arith.constant 2 : index
    %c0_12 = arith.constant 0 : index
    %c0_13 = arith.constant 0 : index
    %16 = vector.load %arg2[%c2, %c0_12, %c0_13] : memref<3x8x8xbf16, #tpu.memory_space<vmem>>, vector<1x8x8xbf16>
    %17 = vector.shape_cast %16 : vector<1x8x8xbf16> to vector<8x8xbf16>
    %cst_14 = arith.constant dense<0.000000e+00> : vector<32x8xf32>
    %18 = tpu.matmul %3, %17, %cst_14 {dimension_numbers = #tpu.dot_dimension_numbers<[1], [0], [0], [1], [0, 0, 1, 1], [], []>} : vector<32x8xbf16>, vector<8x8xbf16>, vector<32x8xf32> -> vector<32x8xf32>
    %c2_15 = arith.constant 2 : index
    %c0_16 = arith.constant 0 : index
    %19 = vector.load %arg3[%c2_15, %c0_16] : memref<3x8xf32, #tpu.memory_space<vmem>>, vector<1x8xf32>
    %20 = vector.broadcast %19 : vector<1x8xf32> to vector<32x8xf32>
    %21 = arith.addf %18, %20 : vector<32x8xf32>
    %22 = arith.truncf %9 : vector<32x8xf32> to vector<32x8xbf16>
    %23 = vector.shape_cast %22 : vector<32x8xbf16> to vector<1x32x8xbf16>
    %24 = arith.truncf %15 : vector<32x8xf32> to vector<32x8xbf16>
    %25 = vector.shape_cast %24 : vector<32x8xbf16> to vector<1x32x8xbf16>
    %26 = arith.truncf %21 : vector<32x8xf32> to vector<32x8xbf16>
    %27 = vector.shape_cast %26 : vector<32x8xbf16> to vector<1x32x8xbf16>
    %cst_17 = arith.constant dense<0.000000e+00> : vector<1x32x32xf32>
    %28 = tpu.matmul %23, %25, %cst_17 {dimension_numbers = #tpu.dot_dimension_numbers<[2], [2], [1], [1], [0, 0, 0, 1, 1, 1], [0], [0]>} : vector<1x32x8xbf16>, vector<1x32x8xbf16>, vector<1x32x32xf32> -> vector<1x32x32xf32>
    %cst_18 = arith.constant dense<0xFF800000> : vector<1x32xf32>
    %29 = vector.multi_reduction <maximumf>, %28, %cst_18 [2] : vector<1x32x32xf32> to vector<1x32xf32>
    %30 = vector.shape_cast %29 : vector<1x32xf32> to vector<1x32x1xf32>
    %31 = vector.broadcast %30 : vector<1x32x1xf32> to vector<1x32x32xf32>
    %32 = arith.subf %28, %31 : vector<1x32x32xf32>
    %33 = math.exp %32 : vector<1x32x32xf32>
    %cst_19 = arith.constant dense<0.000000e+00> : vector<1x32xf32>
    %34 = vector.multi_reduction <add>, %33, %cst_19 [2] : vector<1x32x32xf32> to vector<1x32xf32>
    %35 = vector.shape_cast %34 : vector<1x32xf32> to vector<1x32x1xf32>
    %36 = tpu.reciprocal %35 {approx = true} : vector<1x32x1xf32> -> vector<1x32x1xf32>
    %37 = vector.broadcast %36 : vector<1x32x1xf32> to vector<1x32x32xf32>
    %38 = arith.mulf %33, %37 : vector<1x32x32xf32>
    %39 = arith.truncf %38 : vector<1x32x32xf32> to vector<1x32x32xbf16>
    %cst_20 = arith.constant dense<0.000000e+00> : vector<1x32x8xf32>
    %40 = tpu.matmul %39, %27, %cst_20 {dimension_numbers = #tpu.dot_dimension_numbers<[2], [1], [1], [2], [0, 0, 0, 1, 1, 2], [0], [0]>} : vector<1x32x32xbf16>, vector<1x32x8xbf16>, vector<1x32x8xf32> -> vector<1x32x8xf32>
    %41 = arith.truncf %40 : vector<1x32x8xf32> to vector<1x32x8xbf16>
    %42 = vector.shape_cast %41 : vector<1x32x8xbf16> to vector<32x8xbf16>
    %c0_21 = arith.constant 0 : index
    %c0_22 = arith.constant 0 : index
    %43 = vector.load %arg4[%c0_21, %c0_22] : memref<8x8xbf16, #tpu.memory_space<vmem>>, vector<8x8xbf16>
    %cst_23 = arith.constant dense<0.000000e+00> : vector<32x8xf32>
    %44 = tpu.matmul %42, %43, %cst_23 {dimension_numbers = #tpu.dot_dimension_numbers<[1], [0], [0], [1], [0, 0, 1, 1], [], []>} : vector<32x8xbf16>, vector<8x8xbf16>, vector<32x8xf32> -> vector<32x8xf32>
    %c0_24 = arith.constant 0 : index
    %c0_25 = arith.constant 0 : index
    %45 = vector.load %arg5[%c0_24, %c0_25] : memref<1x8xf32, #tpu.memory_space<vmem>>, vector<1x8xf32>
    %46 = vector.broadcast %45 : vector<1x8xf32> to vector<32x8xf32>
    %47 = arith.addf %44, %46 : vector<32x8xf32>
    %48 = vector.shape_cast %47 : vector<32x8xf32> to vector<1x32x8xf32>
    %49 = tpu.transpose %48, [0, 2, 1] : vector<1x32x8xf32> -> vector<1x8x32xf32>
    %c0_26 = arith.constant 0 : index
    %c0_27 = arith.constant 0 : index
    %c0_28 = arith.constant 0 : index
    %50 = vector.load %arg6[%c0_26, %c0_27, %c0_28] : memref<1x8x32xf32, #tpu.memory_space<vmem>>, vector<1x8x32xf32>
    tpu.vector_store %arg6[%c0_26, %c0_27, %c0_28], %49 {strides = array<i32>} : memref<1x8x32xf32, #tpu.memory_space<vmem>>, vector<1x8x32xf32>,
    return
  }
  func.func @transform_0(%arg0: i32) -> (i32, i32, i32) {
    %c0_i32 = arith.constant 0 : i32
    %c0_i32_0 = arith.constant 0 : i32
    %c0_i32_1 = arith.constant 0 : i32
    return %arg0, %c0_i32, %c0_i32_0 : i32, i32, i32
  }
  func.func @transform_1(%arg0: i32) -> (i32, i32, i32) {
    %c0_i32 = arith.constant 0 : i32
    %c0_i32_0 = arith.constant 0 : i32
    %c0_i32_1 = arith.constant 0 : i32
    %c0_i32_2 = arith.constant 0 : i32
    return %c0_i32, %c0_i32_0, %c0_i32_1 : i32, i32, i32
  }
  func.func @transform_2(%arg0: i32) -> (i32, i32) {
    %c0_i32 = arith.constant 0 : i32
    %c0_i32_0 = arith.constant 0 : i32
    %c0_i32_1 = arith.constant 0 : i32
    return %c0_i32, %c0_i32_0 : i32, i32
  }
  func.func @transform_3(%arg0: i32) -> (i32, i32) {
    %c0_i32 = arith.constant 0 : i32
    %c0_i32_0 = arith.constant 0 : i32
    %c0_i32_1 = arith.constant 0 : i32
    return %c0_i32, %c0_i32_0 : i32, i32
  }
  func.func @transform_4(%arg0: i32) -> (i32, i32) {
    %c0_i32 = arith.constant 0 : i32
    %c0_i32_0 = arith.constant 0 : i32
    %c0_i32_1 = arith.constant 0 : i32
    return %c0_i32, %c0_i32_0 : i32, i32
  }
  func.func @transform_5(%arg0: i32) -> (i32, i32, i32) {
    %c0_i32 = arith.constant 0 : i32
    %c0_i32_0 = arith.constant 0 : i32
    %c0_i32_1 = arith.constant 0 : i32
    return %arg0, %c0_i32, %c0_i32_0 : i32, i32, i32
  }
}

</mosaic_0001>

<bundles_post_ra>
// kernel: gs_attention.1
= control target key start
LH: loop header
LB: loop body
LE: loop exit
PB: predicated region body
PF: predicated region fallthrough
CT: control target
= control target key end

     0   :  { %10 = vsyncpa [#allocation3], 0  ;;  %s955_s0 = inlined_call_operand.vmem [shape: f32[2,8,32], index: 0, kind: input, shape index: {}]   ;;  %s956_s1 = inlined_call_operand.vmem [shape: bf16[3,8,8], index: 1, kind: input, shape index: {}]   ;;  %s957_s2 = inlined_call_operand.vmem [shape: f32[3,8], index: 2, kind: input, shape index: {}]   ;;  %s958_s3 = inlined_call_operand.vmem [shape: bf16[8,8], index: 3, kind: input, shape index: {}]   ;;  %s959_s4 = inlined_call_operand.vmem [shape: f32[1,8], index: 4, kind: input, shape index: {}]   ;;  %s960_s5 = inlined_call_operand.hbm [shape: f32[2,8,32], index: 5, kind: output, shape index: {}]  }
   0x1   :  { %12 = vsyncpa [#allocation3 + $0x1], 0  ;;  %s819_s18 = smov 0   ;;  %s821_s19 = smov 0  }
   0x2   :  { %s823_s20 = smov 0   ;;  %s825_s21 = smov 0  }
   0x3 LB: > { %s840_s22 = sadd.s32 4294967295, %s787_s21   ;;  %s638_s23 = sadd.s32 4294967294, %s787_s21   ;;  %s787_s21 = sphi %s825_s21, %s966_s21   ;;  %s783_s20 = sphi %s823_s20, %s965_s20   ;;  %s779_s19 = sphi %s821_s19, %s964_s19   ;;  %s775_s18 = sphi %s819_s18, %s963_s18  }
   0x4   : > { %s844_s24 = sadd.s32 1, %s787_s21   ;;  %s135_s25 = sadd.s32 1, %s783_s20 }
   0x5   : > { %s132_s26 = ssub.s32 %s787_s21, %s844_s24  ;;  %p145_p0 = scmp.ne.s32.totalorder %s783_s20, %s779_s19 }
   0x6   : > { %p133_p1 = scmp.eq.s32.totalorder %s132_s26, 0  ;;  %p146_p2 = scmp.eq.s32.totalorder %s840_s22, 1 }
   0x7   : > { %p151_p3 = scmp.ne.s32.totalorder %s779_s19, %s775_s18  ;;  %p152_p4 = scmp.eq.s32.totalorder %s638_s23, 1 }
   0x8   : > { %s855_s27 = scalar_select %p133_p1, %s783_s20, %s135_s25  }
   0x9   : > { %p857_p5 = por %p146_p2, %p145_p0  ;;  %p861_p6 = por %p152_p4, %p151_p3 }
   0xa   : > { %p641_p7 = scmp.ge.s32.totalorder %s787_s21, 1  ;;  %p189_p8 = scmp.lt.s32.totalorder %s787_s21, 3 }
   0xc   : > { %p190_p9 = pnand %p641_p7, %p189_p8 }
   0xd   : > { %p216_p10 = scmp.lt.s32.totalorder (!%p190_p9), %s840_s22, 1  ;;  %s659_s12 = sshll.u32 (!%p190_p9), %s840_s22, 3 }
   0xe   : > { %193 = sbr.rel (%p190_p9) target bundleno = 1204 (0x4b4), region = 40  ;;  %s574_s15 = scalar_lea.hbm (!%p190_p9), %s960_s5, %s659_s12 }
   0xf   : > { %s578_s23 = sshll.u32 (!%p190_p9), %s574_s15, 4  ;;  %s745_s7 = scalar_lea.hbm (!%p190_p9), %s960_s5, 16  ;;  %s579_s23 = int_to_ptr.hbm [resolvable:$true] %s578_s23 }
  0x10   : > { %s739_s26 = sshra.s32 (!%p190_p9), %s579_s23, 4  ;;  %s740_s26 = int_to_ptr.hbm [resolvable:$true] %s739_s26 }
  0x11   : > { %s741_s30 = scalar_lea.hbm (!%p190_p9), %s740_s26, 8  ;;  %p746_p0 = scmp.lt.s32.totalorder (!%p190_p9), %s740_s26, %s960_s5 }
  0x12   : > { %p742_p11 = scmp.ne.s32.totalorder (!%p190_p9), %s740_s26, %s741_s30  ;;  %p747_p1 = scmp.lt.s32.totalorder (!%p190_p9), %s745_s7, %s741_s30 }
  0x13   : > { %v239_v0 = vld [vmem:[%s956_s1] sm:$0xf]  ;;  %vm249_vm0 = vcmask 1043456   ;;  %v646_v2 = vld [vmem:[%s956_s1 + $0x4] sm:$0xf]  ;;  %s217_s9 = scalar_select %p216_p10, %s840_s22, 1 }
  0x14   : > { %v251_v1 = vsel %vm249_vm0, %v239_v0, 0  ;;  %v277_v3 = vsel %vm249_vm0, %v646_v2, 0  ;;  %v649_v6 = vld [vmem:[%s956_s1 + $0x8] sm:$0xf]  ;;  %vm242_vm1 = vcmask 64512   ;;  %vm387_vm2 = vcmask 261120   ;;  %p743_p12 = pnand %p742_p11, %p857_p5  ;;  %p748_p2 = por %p747_p1, %p746_p0 }
  0x15   : > { %260 = vmatpush.bf16.msra.mxu0 %v251_v1  ;;  %662 = vmatpush.bf16.msra.mxu2 %v251_v1  ;;  %s643_s10 = sshll.u32 %s217_s9, 3  ;;  %v303_v7 = vsel %vm249_vm0, %v649_v6, 0  ;;  %v706_v13 = vld [vmem:[%s957_s2 + $0x1] ss:$0 sm:$0xff]  ;;  %v705_v28 = vld [vmem:[%s957_s2] ss:$0 sm:$0xff] }
  0x16   : > { %286 = vmatpush.bf16.msra.mxu1 %v277_v3  ;;  %663 = vmatpush.bf16.msra.mxu3 %v277_v3  ;;  %s219_s13 = scalar_lea.vmem %s955_s0, %s643_s10  ;;  %v707_v47 = vld [vmem:[%s957_s2 + $0x2] ss:$0 sm:$0xff]  ;;  %s213_s10 = sand.u32 1, %s779_s19  }
  0x17   : > { %v221_v4 = vld [vmem:[%s219_s13] sm:$0xff]  ;;  %s642_s11 = sshll.u32 %s213_s10, 3  ;;  %s564_s25 = scalar_lea.sflag [#allocation3], %s213_s10 }
  0x18   : > { %v222_v5 = vpack.c.bf16 %v221_v4, %v221_v4  ;;  %s215_s16 = scalar_lea.vmem [#allocation2], %s642_s11  ;;  %p744_p13 = pneg %p743_p12 }
  0x19   : > { %312 = vmatpush.bf16.msrb.mxu2 %v303_v7  ;;  %s576_s17 = sshll.u32 %s215_s16, 4  ;;  %s577_s17 = int_to_ptr.vmem [resolvable:$true] %s576_s17 }
  0x1a   : > { %223 = vxpose.xlu0.c.b16.start.end [1/1] (short) (narrow) %v222_v5, 32  ;;  %p749_p3 = pnand %p748_p2, %p744_p13 }
  0xc6   : > { %v231_v8 = vpop.trf.xlu0 }
  0xc7   : > { %644 = vmatmul.msk.bf16.vlgmr.msra.gmra.mxu0 %vm242_vm1, %v231_v8  ;;  %647 = vmatmul.msk.bf16.vlgmr.msra.gmra.mxu1 %vm242_vm1, %v231_v8 }
  0xd6   : > { %v232_v9 = vpop.trf.xlu0 }
  0xd7   : > { %645 = vmatmul.msk.bf16.vlgmr.msra.gmra.mxu2 %vm242_vm1, %v232_v9  ;;  %648 = vmatmul.msk.bf16.vlgmr.msra.gmra.mxu3 %vm242_vm1, %v232_v9 }
  0xe7   : > { %650 = vmatmul.msk.bf16.vlgmr.msrb.gmra.mxu2 %vm242_vm1, %v231_v8 }
  0xf7   : > { %651 = vmatmul.msk.bf16.gmra.mxu2 %vm242_vm1, %v232_v9 }
 0x144   : > { %v288_v10 = vpop.f32.mrf.mxu1  ;;  %v262_v15 = vpop.f32.mrf.mxu0 }
 0x145   : > { %v289_v19 = vadd.f32 %v706_v13, %v288_v10  ;;  %v263_v35 = vadd.f32 %v705_v28, %v262_v15 }
 0x147   : > { %v328_v24 = vpack.c.bf16 %v289_v19, %v289_v19  ;;  %v324_v38 = vpack.c.bf16 %v263_v35, %v263_v35 }
 0x149   : > { %v350_v32 = vunpack.c.l.b16 %v328_v24  ;;  %v340_v42 = vunpack.c.l.b16 %v324_v38 }
 0x14c   : > { %v290_v16 = vpop.f32.mrf.mxu1  ;;  %v264_v30 = vpop.f32.mrf.mxu0 }
 0x14d   : > { %v291_v20 = vadd.f32 %v706_v13, %v290_v16  ;;  %v265_v36 = vadd.f32 %v705_v28, %v264_v30 }
 0x14f   : > { %v329_v25 = vpack.c.bf16 %v291_v20, %v291_v20  ;;  %v325_v39 = vpack.c.bf16 %v265_v36, %v265_v36 }
 0x151   : > { %v351_v33 = vunpack.c.l.b16 %v329_v25  ;;  %v341_v43 = vunpack.c.l.b16 %v325_v39 }
 0x153   : > { %v354_v37 = vpack.c.b16 %v351_v33, %v350_v32  ;;  %v344_v44 = vpack.c.b16 %v341_v43, %v340_v42 }
 0x155   : > { %v363_v41 = vsel %vm242_vm1, %v354_v37, 0 }
 0x15a   : > { %v267_v11 = vpop.f32.mrf.mxu2  ;;  %v293_v12 = vpop.f32.mrf.mxu3 }
 0x15b   : > { %v294_v14 = vadd.f32 %v706_v13, %v293_v12  ;;  %v268_v48 = vadd.f32 %v705_v28, %v267_v11 }
 0x15d   : > { %v330_v21 = vpack.c.bf16 %v294_v14, %v294_v14  ;;  %v326_v53 = vpack.c.bf16 %v268_v48, %v268_v48 }
 0x15f   : > { %v352_v26 = vunpack.c.l.b16 %v330_v21  ;;  %v342_v60 = vunpack.c.l.b16 %v326_v53 }
 0x162   : > { %v269_v17 = vpop.f32.mrf.mxu2  ;;  %v295_v18 = vpop.f32.mrf.mxu3 }
 0x163   : > { %v296_v22 = vadd.f32 %v706_v13, %v295_v18  ;;  %v270_v46 = vadd.f32 %v705_v28, %v269_v17 }
 0x165   : > { %v331_v23 = vpack.c.bf16 %v296_v22, %v296_v22  ;;  %v327_v50 = vpack.c.bf16 %v270_v46, %v270_v46 }
 0x167   : > { %v353_v27 = vunpack.c.l.b16 %v331_v23  ;;  %v343_v57 = vunpack.c.l.b16 %v327_v50 }
 0x169   : > { %v355_v29 = vpack.c.b16 %v353_v27, %v352_v26  ;;  %v345_v0 = vpack.c.b16 %v343_v57, %v342_v60 }
 0x16a   : > { %v314_v31 = vpop.f32.mrf.mxu2 }
 0x16b   : > { %v366_v34 = vsel %vm242_vm1, %v355_v29, 0  ;;  %v315_v54 = vadd.f32 %v707_v47, %v314_v31 }
 0x16c   : > { %374 = vmatpush.bf16.xpose.msrb.mxu3 %v366_v34 }
 0x16d   : > { %v332_v61 = vpack.c.bf16 %v315_v54, %v315_v54 }
 0x16f   : > { %v450_v3 = vunpack.c.l.b16 %v332_v61 }
 0x172   : > { %v316_v40 = vpop.f32.mrf.mxu2 }
 0x173   : > { %v317_v51 = vadd.f32 %v707_v47, %v316_v40 }
 0x174   : > { %375 = vmatpush.bf16.xpose.msrb.mxu3 %v363_v41 }
 0x175   : > { %v333_v58 = vpack.c.bf16 %v317_v51, %v317_v51 }
 0x177   : > { %v451_v1 = vunpack.c.l.b16 %v333_v58 }
 0x179   : > { %v454_v4 = vpack.c.b16 %v451_v1, %v450_v3 }
 0x17a   : > { %v319_v45 = vpop.f32.mrf.mxu2 }
 0x17b   : > { %652 = vmatmul.msk.bf16.vlgmr.msrb.gmra.mxu3 %vm242_vm1, %v344_v44  ;;  %v320_v49 = vadd.f32 %v707_v47, %v319_v45 }
 0x17d   : > { %v334_v55 = vpack.c.bf16 %v320_v49, %v320_v49 }
 0x17f   : > { %v452_v62 = vunpack.c.l.b16 %v334_v55  ;;  %v487_v55 = vld [vmem:[%s958_s3] sm:$0xf] }
 0x182   : > { %v321_v52 = vpop.f32.mrf.mxu2 }
 0x183   : > { %v322_v56 = vadd.f32 %v707_v47, %v321_v52 }
 0x185   : > { %v335_v59 = vpack.c.bf16 %v322_v56, %v322_v56  ;;  %v509_v56 = vsel %vm249_vm0, %v487_v55, 0 }
 0x186   : > { %518 = vmatpush.bf16.msrb.mxu1 %v509_v56 }
 0x187   : > { %v453_v63 = vunpack.c.l.b16 %v335_v59 }
 0x189   : > { %v455_v2 = vpack.c.b16 %v453_v63, %v452_v62 }
 0x18b   : > { %653 = vmatmul.msk.bf16.gmra.mxu3 %vm242_vm1, %v345_v0  ;;  %470 = vmatpush.bf16.msrb.mxu0 %v455_v2 }
 0x18f   : > { %471 = vmatpush.bf16.msrb.mxu0 %v454_v4 }
 0x1fe   : > { %v377_v5 = vpop.f32.mrf.mxu3 }
 0x1ff   : > { %v388_v6 = vsel %vm387_vm2, %v377_v5, -inf }
 0x200   : > { %389 = vmax.xlane.f32.xlu0 %v388_v6 }
 0x206   : > { %v379_v7 = vpop.f32.mrf.mxu3 }
 0x207   : > { %v391_v8 = vsel %vm387_vm2, %v379_v7, -inf }
 0x208   : > { %392 = vmax.xlane.f32.xlu1 %v391_v8 }
 0x20e   : > { %v382_v9 = vpop.f32.mrf.mxu3 }
 0x20f   : > { %v394_v10 = vsel %vm387_vm2, %v382_v9, -inf }
 0x210   : > { %395 = vmax.xlane.f32.xlu1 %v394_v10 }
 0x216   : > { %v384_v11 = vpop.f32.mrf.mxu3 }
 0x217   : > { %v397_v12 = vsel %vm387_vm2, %v384_v11, -inf }
 0x218   : > { %398 = vmax.xlane.f32.xlu2 %v397_v12 }
 0x273   : > { %v390_v13 = vpop.xlane.xlu0 %389 }
 0x274   : > { %v400_v14 = vsub.f32 %v377_v5, %v390_v13 }
 0x276   : > { %v404_v15 = vmul.f32 1.442695, %v400_v14 }
 0x278   : > { %709 = vpow2.f32 %v404_v15 }
 0x27b   : > { %v393_v16 = vpop.xlane.xlu1 %392 }
 0x27c   : > { %v401_v17 = vsub.f32 %v379_v7, %v393_v16  ;;  %v708_v7 = vld [vmem:[%s959_s4] ss:$0 sm:$0xff] }
 0x27e   : > { %v710_v18 = vpop.eup %709  ;;  %v406_v19 = vmul.f32 1.442695, %v401_v17 }
 0x27f   : > { %v412_v20 = vsel %vm387_vm2, %v710_v18, 0.0 }
 0x280   : > { %711 = vpow2.f32 %v406_v19  ;;  %413 = vadd.xlane.f32.xlu2 %v412_v20 }
 0x283   : > { %v396_v21 = vpop.xlane.xlu1 %395 }
 0x284   : > { %v402_v22 = vsub.f32 %v382_v9, %v396_v21 }
 0x286   : > { %v712_v23 = vpop.eup %711  ;;  %v408_v24 = vmul.f32 1.442695, %v402_v22 }
 0x287   : > { %v415_v25 = vsel %vm387_vm2, %v712_v23, 0.0 }
 0x288   : > { %713 = vpow2.f32 %v408_v24  ;;  %416 = vadd.xlane.f32.xlu1 %v415_v25 }
 0x28b   : > { %v399_v26 = vpop.xlane.xlu2 %398 }
 0x28c   : > { %v403_v27 = vsub.f32 %v384_v11, %v399_v26 }
 0x28e   : > { %v714_v28 = vpop.eup %713  ;;  %v410_v29 = vmul.f32 1.442695, %v403_v27 }
 0x28f   : > { %v418_v30 = vsel %vm387_vm2, %v714_v28, 0.0 }
 0x290   : > { %715 = vpow2.f32 %v410_v29  ;;  %419 = vadd.xlane.f32.xlu2 %v418_v30 }
 0x296   : > { %v716_v31 = vpop.eup %715 }
 0x297   : > { %v421_v32 = vsel %vm387_vm2, %v716_v31, 0.0 }
 0x298   : > { %422 = vadd.xlane.f32.xlu1 %v421_v32 }
 0x2f3   : > { %v414_v33 = vpop.xlane.xlu2 %413 }
 0x2f4   : > { %717 = vrcp.f32 %v414_v33 }
 0x2fa   : > { %v718_v35 = vpop.eup %717 }
 0x2fb   : > { %v417_v34 = vpop.xlane.xlu1 %416  ;;  %v428_v36 = vmul.f32 %v718_v35, %v710_v18 }
 0x2fc   : > { %719 = vrcp.f32 %v417_v34 }
 0x2fd   : > { %v432_v38 = vpack.c.bf16 %v428_v36, %v428_v36 }
 0x2ff   : > { %v440_v42 = vunpack.c.l.b16 %v432_v38 }
 0x302   : > { %v720_v37 = vpop.eup %719 }
 0x303   : > { %v429_v39 = vmul.f32 %v720_v37, %v712_v23  ;;  %v420_v40 = vpop.xlane.xlu2 %419 }
 0x304   : > { %721 = vrcp.f32 %v420_v40 }
 0x305   : > { %v433_v41 = vpack.c.bf16 %v429_v39, %v429_v39 }
 0x307   : > { %v441_v43 = vunpack.c.l.b16 %v433_v41 }
 0x309   : > { %v444_v44 = vpack.c.b16 %v441_v43, %v440_v42 }
 0x30a   : > { %v722_v46 = vpop.eup %721 }
 0x30b   : > { %v423_v45 = vpop.xlane.xlu1 %422  ;;  %654 = vmatmul.msk.bf16.vlgmr.msrb.gmra.mxu0 %vm387_vm2, %v444_v44  ;;  %v430_v47 = vmul.f32 %v722_v46, %v714_v28 }
 0x30c   : > { %723 = vrcp.f32 %v423_v45 }
 0x30d   : > { %v434_v50 = vpack.c.bf16 %v430_v47, %v430_v47 }
 0x30f   : > { %v442_v52 = vunpack.c.l.b16 %v434_v50 }
 0x312   : > { %v724_v48 = vpop.eup %723 }
 0x313   : > { %v431_v49 = vmul.f32 %v724_v48, %v716_v31 }
 0x315   : > { %v435_v51 = vpack.c.bf16 %v431_v49, %v431_v49 }
 0x317   : > { %v443_v53 = vunpack.c.l.b16 %v435_v51 }
 0x319   : > { %v445_v54 = vpack.c.b16 %v443_v53, %v442_v52 }
 0x31b   : > { %655 = vmatmul.msk.bf16.gmra.mxu0 %vm387_vm2, %v445_v54 }
 0x388   : > { %v473_v57 = vpop.f32.mrf.mxu0 }
 0x389   : > { %v483_v58 = vpack.c.bf16 %v473_v57, %v473_v57 }
 0x38b   : > { %v496_v61 = vunpack.c.l.b16 %v483_v58 }
 0x390   : > { %v475_v59 = vpop.f32.mrf.mxu0 }
 0x391   : > { %v484_v60 = vpack.c.bf16 %v475_v59, %v475_v59 }
 0x393   : > { %v497_v62 = vunpack.c.l.b16 %v484_v60 }
 0x395   : > { %v500_v63 = vpack.c.b16 %v497_v62, %v496_v61 }
 0x397   : > { %656 = vmatmul.msk.bf16.vlgmr.msrb.gmra.mxu1 %vm242_vm1, %v500_v63 }
 0x398   : > { %v478_v0 = vpop.f32.mrf.mxu0 }
 0x399   : > { %v485_v1 = vpack.c.bf16 %v478_v0, %v478_v0 }
 0x39b   : > { %v498_v4 = vunpack.c.l.b16 %v485_v1 }
 0x3a0   : > { %v480_v2 = vpop.f32.mrf.mxu0 }
 0x3a1   : > { %v486_v3 = vpack.c.bf16 %v480_v2, %v480_v2 }
 0x3a3   : > { %v499_v5 = vunpack.c.l.b16 %v486_v3 }
 0x3a5   : > { %v501_v6 = vpack.c.b16 %v499_v5, %v498_v4 }
 0x3a7   : > { %657 = vmatmul.msk.bf16.gmra.mxu1 %vm242_vm1, %v501_v6 }
 0x414   : > { %v520_v8 = vpop.f32.mrf.mxu1 }
 0x415   : > { %v521_v9 = vadd.f32 %v708_v7, %v520_v8 }
 0x417   : > { %530 = vxpose.xlu2.b32.start [1/4] (short) (narrow) %v521_v9, 8 }
 0x41c   : > { %v522_v10 = vpop.f32.mrf.mxu1 }
 0x41d   : > { %v523_v11 = vadd.f32 %v708_v7, %v522_v10 }
 0x41f   : > { %531 = vxpose.xlu2.b32.cont [2/4] (short) (narrow) %v523_v11, 8 }
 0x424   : > { %v525_v12 = vpop.f32.mrf.mxu1 }
 0x425   : > { %v526_v13 = vadd.f32 %v708_v7, %v525_v12 }
 0x427   : > { %532 = vxpose.xlu2.b32.cont [3/4] (short) (narrow) %v526_v13, 8 }
 0x42c   : > { %v527_v14 = vpop.f32.mrf.mxu1 }
 0x42d   : > { %v528_v15 = vadd.f32 %v708_v7, %v527_v14 }
 0x42f   : > { %533 = vxpose.xlu2.b32.end [4/4] (short) (narrow) %v528_v15, 8 }
 0x4b0   : > { %v546_v16 = vpop.trf.xlu2 }
 0x4b1   : > { %562 = vst.msk [vmem:[%s215_s16] sm:$0xff] %vm387_vm2, %v546_v16 }
 0x4b2   : > { %752 = shalt.err (!%p749_p3)
}
 0x4b3   : > { %664 = dma.vmem_to_hbm [thread:$0]  (%p857_p5), %s577_s17, 128, %s579_s23, %s564_s25  }
 0x4b4 PF: > { %p670_p4 = scmp.ge.s32.totalorder %s787_s21, 2  ;;  %s590_s10 = sand.u32 1, %s775_s18  }
 0x4b5   : > { %s591_s11 = scalar_lea.sflag [#allocation3], %s590_s10 }
 0x4b6   : > { %p667_p7 = pnand %p670_p4, %p861_p6 }
 0x4b8   : > { %p668_p8 = pneg %p667_p7 }
 0x4ba   : > { %770 = dma.done.wait (%p668_p8), %s591_s11, 128  }
 0x4bb   : > { %772 = vsyncadd (%p668_p8), %s591_s11, 4294967168  ;;  %p15_p9 = scmp.ge.s32.totalorder %s844_s24, 4   ;;  %s963_s18 = smov %s779_s19 }
 0x4bc   : > { %s964_s19 = smov %s783_s20  ;;  %s965_s20 = smov %s855_s27 }
 0x4bd   : > { %s966_s21 = smov %s844_s24  ;;  %17 = sbr.rel (!%p15_p9) target bundleno = 3 (0x3), region = 77 }
 0x4c2   :  { %597 = vsyncpa [#allocation3], 1 }
 0x4c3   :  { %599 = vsyncpa [#allocation3 + $0x1], 1 }

</bundles_post_ra>
